<compile_context>
chip_gen: v7x
topology: tpu7x:2x2x1
jax: 0.10.0
libtpu: 0.0.40
codegen_flags: <defaults>
</compile_context>

<pallas_src>
import jax
import jax.numpy as jnp
from jax.experimental import pallas as pl
from jax.experimental.pallas import tpu as pltpu


# ---------------- hardware / tiling helpers ----------------

def _sublane(dtype):
    # Sub-32-bit dtypes pack along sublanes: need taller row granularity.
    return {4: 8, 2: 16, 1: 32}.get(jnp.dtype(dtype).itemsize, 8)


def _vmem_budget():
    """Trace-time (scoped vmem_limit_bytes, usable bytes for pipeline tiles)."""
    try:
        vmem = pltpu.get_tpu_info().vmem_capacity_bytes
    except Exception:
        vmem = None
    if vmem is not None and vmem >= (100 << 20):   # 128 MiB VMEM chips (v5e/v6e)
        limit = 64 * 1024 * 1024
    else:                                          # 64 MiB VMEM chips (v7x) / unknown
        limit = 32 * 1024 * 1024
    return limit, (limit * 3) // 4                 # keep ~25% headroom


def _pick_lanes(n):
    """Largest lane width (multiple of 128) that evenly divides n."""
    for lanes in (2048, 1024, 512, 256, 128):
        if n % lanes == 0:
            return lanes
    return None


def _tile_rows(budget_bytes, lanes, itemsize, sub, rows):
    """Block rows: as many as fit the per-tile byte budget, rounded down to the
    dtype's sublane multiple; full extent if everything fits in one block."""
    cap = max(sub, (budget_bytes // (lanes * itemsize)) // sub * sub)
    return rows if rows <= cap else cap


# ---------------- kernels ----------------

def _add_kernel(a_ref, b_ref, o_ref):
    o_ref[...] = a_ref[...] + b_ref[...]


def _prod_kernel(a_ref, b_ref, o_ref):
    o_ref[...] = a_ref[...] * b_ref[...]


def _concat_kernel(a_ref, b_ref, o_ref):
    # a_ref / b_ref: (1, tr, lanes); o_ref: (1, 2, tr, lanes).
    # Both input DMA streams are live every step; both output halves written.
    o_ref[0, 0] = a_ref[0]
    o_ref[0, 1] = b_ref[0]


# ---------------- add / prod ----------------

def _merge_elementwise(up1, up2, kernel, xla_fallback):
    shape, dtype = up1.shape, up1.dtype
    n = up1.size
    itemsize = jnp.dtype(dtype).itemsize

    lanes = _pick_lanes(n)
    if lanes is None:
        # Lane-sparse odd shapes hit masked-store / tiny-tile anti-patterns in
        # a Pallas kernel; XLA's fused elementwise is already at HBM roofline.
        return xla_fallback(up1, up2)

    vmem_limit, usable = _vmem_budget()
    rows = n // lanes
    sub = _sublane(dtype)
    # 3 streams (a, b, out) x double buffer -> 6 live tiles per step.
    tr = _tile_rows(usable // 6, lanes, itemsize, sub, rows)
    grid_r = pl.cdiv(rows, tr)                     # edge block masked by Pallas

    a2 = up1.reshape(rows, lanes)                  # contiguous reshape: free
    b2 = up2.reshape(rows, lanes)
    spec = pl.BlockSpec((tr, lanes), lambda i: (i, 0))

    out = pl.pallas_call(
        kernel,
        out_shape=jax.ShapeDtypeStruct((rows, lanes), dtype),
        grid=(grid_r,),
        in_specs=[spec, spec],
        out_specs=spec,
        compiler_params=pltpu.CompilerParams(
            dimension_semantics=("parallel",),
            vmem_limit_bytes=vmem_limit,
        ),
        cost_estimate=pl.CostEstimate(
            flops=n, transcendentals=0, bytes_accessed=3 * n * itemsize),
    )(a2, b2)
    return out.reshape(shape)


# ---------------- concat (channel dim) ----------------

def _merge_concat(up1, up2):
    # NCHW channel concat is contiguous per batch:
    #   out[b].flat = [up1[b].flat (m elems), up2[b].flat (m elems)], m = C*H*W
    # so view the output as (B, 2, r1, lanes) and copy both inputs per step.
    B, C, H, W = up1.shape
    dtype = up1.dtype
    itemsize = jnp.dtype(dtype).itemsize
    m = C * H * W

    lanes = _pick_lanes(m)
    if lanes is None:
        # Lane-sparse per-batch size: defer to XLA's concatenate (roofline).
        return jnp.concatenate((up1, up2), axis=1)

    vmem_limit, usable = _vmem_budget()
    r1 = m // lanes                                # rows per (batch, input) segment
    sub = _sublane(dtype)
    # Per step: a-tile + b-tile + double-width out-tile, double buffered -> 8.
    tr = _tile_rows(usable // 8, lanes, itemsize, sub, r1)
    nr = pl.cdiv(r1, tr)                           # edge block masked by Pallas

    a3 = up1.reshape(B, r1, lanes)
    b3 = up2.reshape(B, r1, lanes)
    in_spec = pl.BlockSpec((1, tr, lanes), lambda b, j: (b, j, 0))
    out_spec = pl.BlockSpec((1, 2, tr, lanes), lambda b, j: (b, 0, j, 0))

    out = pl.pallas_call(
        _concat_kernel,
        out_shape=jax.ShapeDtypeStruct((B, 2, r1, lanes), dtype),
        grid=(B, nr),
        in_specs=[in_spec, in_spec],
        out_specs=out_spec,
        compiler_params=pltpu.CompilerParams(
            dimension_semantics=("parallel", "parallel"),
            vmem_limit_bytes=vmem_limit,
        ),
        cost_estimate=pl.CostEstimate(
            flops=0, transcendentals=0, bytes_accessed=4 * B * m * itemsize),
    )(a3, b3)
    return out.reshape(B, 2 * C, H, W)


# ---------------- public wrapper ----------------

def mergeup(up1, up2, merge_type):
    assert up1.shape == up2.shape and up1.dtype == up2.dtype
    if merge_type == "add":
        return _merge_elementwise(up1, up2, _add_kernel, lambda a, b: a + b)
    if merge_type == "prod":
        return _merge_elementwise(up1, up2, _prod_kernel, lambda a, b: a * b)
    if merge_type == "concat":
        return _merge_concat(up1, up2)
    raise ValueError(f"unknown merge_type {merge_type!r}")


# ---------------- reference (pure JAX) ----------------

def mergeup_ref(up1, up2, merge_type):
    if merge_type == "add":
        return up1 + up2
    if merge_type == "prod":
        return up1 * up2
    if merge_type == "concat":
        return jnp.concatenate((up1, up2), axis=1)
    raise ValueError(merge_type)


if __name__ == "__main__":
    key = jax.random.PRNGKey(0)
    k1, k2, k3, k4 = jax.random.split(key, 4)

    ok = True

    # Lane-friendly main path (Pallas kernels).
    shape = (2, 4, 16, 16)  # N, C, H, W
    up1 = jax.random.normal(k1, shape, dtype=jnp.float32)
    up2 = jax.random.normal(k2, shape, dtype=jnp.float32)
    for mt in ("add", "prod", "concat"):
        out = jax.block_until_ready(mergeup(up1, up2, mt))
        ref = mergeup_ref(up1, up2, mt)
        if out.shape != ref.shape or not jnp.allclose(out, ref, atol=1e-6):
            ok = False
            print(f"MISMATCH merge_type={mt} shape={shape}")

    # Odd-shape path (lane-sparse -> defers to XLA, per perf review).
    shape2 = (2, 3, 10, 10)
    v1 = jax.random.normal(k3, shape2, dtype=jnp.float32)
    v2 = jax.random.normal(k4, shape2, dtype=jnp.float32)
    for mt in ("add", "prod", "concat"):
        out = jax.block_until_ready(mergeup(v1, v2, mt))
        ref = mergeup_ref(v1, v2, mt)
        if out.shape != ref.shape or not jnp.allclose(out, ref, atol=1e-6):
            ok = False
            print(f"MISMATCH merge_type={mt} shape={shape2}")

    if ok:
        print("KERNEL_OK")
</pallas_src>

<mosaic_0001>
module attributes {stable_mosaic.version = 11 : i64} {
  func.func @_add_kernel(%arg0: i32, %arg1: memref<1x2048xf32, #tpu.memory_space<vmem>>, %arg2: memref<1x2048xf32, #tpu.memory_space<vmem>>, %arg3: memref<1x2048xf32, #tpu.memory_space<vmem>>) attributes {dimension_semantics = [#tpu.dimension_semantics<parallel>], iteration_bounds = array<i64: 1>, scalar_prefetch = 0 : i64, scratch_operands = 0 : i64, tpu.core_type = #tpu.core_type<tc>, window_params = [{transform_indices = @transform_0, window_bounds = array<i64: 1, 2048>}, {transform_indices = @transform_1, window_bounds = array<i64: 1, 2048>}, {transform_indices = @transform_2, window_bounds = array<i64: 1, 2048>}]} {
    %c0 = arith.constant 0 : index
    %c0_0 = arith.constant 0 : index
    %0 = vector.load %arg1[%c0, %c0_0] : memref<1x2048xf32, #tpu.memory_space<vmem>>, vector<1x2048xf32>
    %c0_1 = arith.constant 0 : index
    %c0_2 = arith.constant 0 : index
    %1 = vector.load %arg2[%c0_1, %c0_2] : memref<1x2048xf32, #tpu.memory_space<vmem>>, vector<1x2048xf32>
    %2 = arith.addf %0, %1 : vector<1x2048xf32>
    %c0_3 = arith.constant 0 : index
    %c0_4 = arith.constant 0 : index
    %3 = vector.load %arg3[%c0_3, %c0_4] : memref<1x2048xf32, #tpu.memory_space<vmem>>, vector<1x2048xf32>
    tpu.vector_store %arg3[%c0_3, %c0_4], %2 {strides = array<i32>} : memref<1x2048xf32, #tpu.memory_space<vmem>>, vector<1x2048xf32>,
    return
  }
  func.func @transform_0(%arg0: i32) -> (i32, i32) {
    %c0_i32 = arith.constant 0 : i32
    %c0_i32_0 = arith.constant 0 : i32
    return %arg0, %c0_i32 : i32, i32
  }
  func.func @transform_1(%arg0: i32) -> (i32, i32) {
    %c0_i32 = arith.constant 0 : i32
    %c0_i32_0 = arith.constant 0 : i32
    return %arg0, %c0_i32 : i32, i32
  }
  func.func @transform_2(%arg0: i32) -> (i32, i32) {
    %c0_i32 = arith.constant 0 : i32
    %c0_i32_0 = arith.constant 0 : i32
    return %arg0, %c0_i32 : i32, i32
  }
}

</mosaic_0001>

<bundles_post_ra>
// kernel: tpu_custom_call.1
= control target key start
LH: loop header
LB: loop body
LE: loop exit
PB: predicated region body
PF: predicated region fallthrough
CT: control target
= control target key end

     0   :  { %7 = vsyncpa [#allocation3], 0  ;;  %s189_s0 = inlined_call_operand.hbm [shape: f32[1,2048], index: 0, kind: input, shape index: {}]   ;;  %s190_s1 = inlined_call_operand.hbm [shape: f32[1,2048], index: 1, kind: input, shape index: {}]   ;;  %s191_s2 = inlined_call_operand.hbm [shape: f32[1,2048], index: 2, kind: output, shape index: {}]  }
   0x1   :  { %8 = vsyncpa [#allocation6], 0 }
   0x2   :  { %9 = vsyncpa [#allocation4], 0  ;;  %s135_s9 = smov [#allocation2]   ;;  %s136_s11 = smov [#allocation5]  }
   0x3   :  { %s16_s10 = sshll.u32 %s135_s9, 4  ;;  %s26_s12 = sshll.u32 %s136_s11, 4  ;;  %s17_s10 = int_to_ptr.vmem [resolvable:$true] %s16_s10  ;;  %s27_s12 = int_to_ptr.vmem [resolvable:$true] %s26_s12 }
   0x4   :  { %s63_s15 = scalar_lea.hbm %s189_s0, 256 }
   0x5   :  { %p64_p0 = scmp.ne.s32.totalorder %s189_s0, %s63_s15  ;;  %p67_p1 = scmp.lt.u32.totalorder %s63_s15, %s189_s0 }
   0x7   :  { %p69_p2 = pnand %p67_p1, %p64_p0 }
   0x9   :  { %72 = shalt.err (!%p69_p2)
}
   0xa   :  { %s73_s20 = scalar_lea.vmem %s17_s10, 256  ;;  %p78_p4 = scmp.lt.s32.totalorder %s17_s10, %s17_s10 }
   0xb   :  { %p74_p3 = scmp.ne.s32.totalorder %s17_s10, %s73_s20  ;;  %p79_p5 = scmp.lt.s32.totalorder %s73_s20, %s73_s20 }
   0xd   :  { %p80_p6 = por %p79_p5, %p78_p4 }
   0xf   :  { %p81_p7 = pnand %p80_p6, %p74_p3 }
  0x11   :  { %84 = shalt.err (!%p81_p7)
}
  0x12   :  { %19 = dma.hbm_to_vmem [thread:$0]  %s189_s0, 256, %s17_s10, [#allocation3]  }
  0x13   :  { %s85_s25 = scalar_lea.hbm %s190_s1, 256 }
  0x14   :  { %p86_p8 = scmp.ne.s32.totalorder %s190_s1, %s85_s25  ;;  %p89_p9 = scmp.lt.u32.totalorder %s85_s25, %s190_s1 }
  0x16   :  { %p91_p10 = pnand %p89_p9, %p86_p8 }
  0x18   :  { %94 = shalt.err (!%p91_p10)
}
  0x19   :  { %s95_s30 = scalar_lea.vmem %s27_s12, 256  ;;  %p100_p12 = scmp.lt.s32.totalorder %s27_s12, %s27_s12 }
  0x1a   :  { %p96_p11 = scmp.ne.s32.totalorder %s27_s12, %s95_s30  ;;  %p101_p13 = scmp.lt.s32.totalorder %s95_s30, %s95_s30 }
  0x1c   :  { %p102_p0 = por %p101_p13, %p100_p12 }
  0x1e   :  { %p103_p1 = pnand %p102_p0, %p96_p11 }
  0x20   :  { %106 = shalt.err (!%p103_p1)
}
  0x21   :  { %29 = dma.hbm_to_vmem [thread:$0]  %s190_s1, 256, %s27_s12, [#allocation6]  }
  0x22   :  { %129 = dma.done.wait [#allocation3], 256  }
  0x23   :  { %130 = vsyncadd [#allocation3], 4294967040 }
  0x24   :  { %131 = dma.done.wait [#allocation6], 256  }
  0x25   :  { %132 = vsyncadd [#allocation6], 4294967040  ;;  %s137_s4 = smov [#allocation7]   ;;  %v36_v0 = vld [vmem:[#allocation2] sm:$0xff]  ;;  %v38_v1 = vld [vmem:[#allocation5] sm:$0xff] }
  0x26   :  { %s50_s5 = sshll.u32 %s137_s4, 4  ;;  %v37_v2 = vld [vmem:[#allocation2 + $0x8] sm:$0xff]  ;;  %v40_v3 = vadd.f32 %v38_v1, %v36_v0  ;;  %v39_v4 = vld [vmem:[#allocation5 + $0x8] sm:$0xff]  ;;  %s51_s5 = int_to_ptr.vmem [resolvable:$true] %s50_s5 }
  0x27   :  { %v41_v5 = vadd.f32 %v39_v4, %v37_v2  ;;  %s107_s6 = scalar_lea.vmem %s51_s5, 256  ;;  %p112_p3 = scmp.lt.s32.totalorder %s51_s5, %s51_s5 }
  0x28   :  { %42 = vst [vmem:[#allocation7] sm:$0xff] %v40_v3  ;;  %p108_p2 = scmp.ne.s32.totalorder %s51_s5, %s107_s6  ;;  %p113_p4 = scmp.lt.s32.totalorder %s107_s6, %s107_s6 }
  0x29   :  { %43 = vst [vmem:[#allocation7 + $0x8] sm:$0xff] %v41_v5 }
  0x2a   :  { %p114_p5 = por %p113_p4, %p112_p3 }
  0x2c   :  { %p115_p6 = pnand %p114_p5, %p108_p2 }
  0x2e   :  { %118 = shalt.err (!%p115_p6)
}
  0x2f   :  { %s119_s8 = scalar_lea.hbm %s191_s2, 256 }
  0x30   :  { %p120_p7 = scmp.ne.s32.totalorder %s191_s2, %s119_s8  ;;  %p123_p8 = scmp.lt.u32.totalorder %s119_s8, %s191_s2 }
  0x32   :  { %p125_p9 = pnand %p123_p8, %p120_p7 }
  0x34   :  { %128 = shalt.err (!%p125_p9)
}
  0x35   :  { %53 = dma.vmem_to_hbm [thread:$0]  %s51_s5, 256, %s191_s2, [#allocation4]  }
  0x36   :  { %133 = dma.done.wait [#allocation4], 256  }
  0x37   :  { %134 = vsyncadd [#allocation4], 4294967040 }
  0x38   :  { %57 = vsyncpa [#allocation3], 1 }
  0x39   :  { %58 = vsyncpa [#allocation6], 1 }
  0x3a   :  { %59 = vsyncpa [#allocation4], 1 }

</bundles_post_ra>
